<compile_context>
chip_gen: v5e
topology: v5e:2x2
jax: 0.10.0
libtpu: 0.0.40
codegen_flags: <defaults>
</compile_context>

<pallas_src>
import jax
import jax.numpy as jnp
import numpy as np
from jax.experimental import pallas as pl
from jax.experimental.pallas import tpu as pltpu

# ----------------------------- configuration -------------------------------
NUM_BLOCKS = 2          # num_blocks
NUM_LAYERS = 4          # num_layers (FC layers per block)
LAYER_WIDTH = 32        # layer_width
NR_PARAMS = 2           # nr_params
ECD = 5                 # expansion_coefficient_dim
IN_LEN = 16             # input_chunk_length
TGT_LEN = 8             # target_length
BATCH = 8

FW = NR_PARAMS * TGT_LEN                   # forecast width (16)
SW = IN_LEN + FW                           # state width: [residual | forecast]
PW = max(SW, LAYER_WIDTH)                  # packed width (32)
MATS_PER_BLOCK = NUM_LAYERS + 1            # NUM_LAYERS FC mats + 1 fused fork/basis
N_MATS = NUM_BLOCKS * MATS_PER_BLOCK

MAX_TILE = 512                             # batch-tile upper bound (sweep 256-512)
_PREC = jax.lax.Precision.HIGHEST          # v5e throughput runs: consider DEFAULT


# ------------------------------- the kernel --------------------------------
def _stack_kernel(x_ref, w_ref, b_ref, res_ref, fcst_ref):
    bt = x_ref.shape[0]
    # state = [ residual(IN_LEN) | accumulated forecast(FW) ]
    # Lane-pad the forecast half in-kernel (one vreg, ~free) instead of a
    # wrapper-side jnp.pad that would cost an extra HBM pass.
    state = jnp.concatenate(
        [x_ref[...], jnp.zeros((bt, PW - IN_LEN), jnp.float32)], axis=-1)

    for blk in range(NUM_BLOCKS):                          # static unroll
        base = blk * MATS_PER_BLOCK

        # ---- FC stack: Linear -> ReLU, NUM_LAYERS times --------------------
        # First-layer weight rows for the forecast columns are zero, so
        # feeding the whole state is exact.
        h = state
        for l in range(NUM_LAYERS):
            h = jnp.maximum(
                jnp.dot(h, w_ref[base + l],
                        preferred_element_type=jnp.float32, precision=_PREC)
                + b_ref[base + l:base + l + 1, :],
                0.0)

        # ---- fused fork + generic basis + residual/forecast update ---------
        # Backcast half of W_comb/b_comb is pre-negated, so one add does both
        # `x -= x_hat` and `forecast += y_hat`.
        state = state + (
            jnp.dot(h, w_ref[base + NUM_LAYERS],
                    preferred_element_type=jnp.float32, precision=_PREC)
            + b_ref[base + NUM_LAYERS:base + NUM_LAYERS + 1, :])

    # Two direct outputs (masked stores from the same vregs); the wrapper does
    # not slice the result any further.
    res_ref[...] = state[:, :IN_LEN]
    fcst_ref[...] = state[:, IN_LEN:SW]


# ------------------------------ tile selection ------------------------------
def _choose_batch_tile(batch: int, max_tile: int = MAX_TILE) -> int:
    """8-sublane-aligned batch tile; gives the grid >=2 steps whenever the
    batch allows so v7x's two TensorCores both get work ("parallel" axis).
    No-op for the B=8 test case (one 8-row tile, one grid step)."""
    bt = min(max_tile, max(batch, 8))
    if batch >= 16:
        half = -(-(batch // 2) // 8) * 8          # ceil(batch/2) rounded to x8
        bt = min(bt, half)
    return max(8, (bt // 8) * 8)


# ------------------------------ the wrapper --------------------------------
@jax.jit
def nbeats_stack_forward(x, w_packed, b_packed):
    batch = x.shape[0]
    bt = _choose_batch_tile(batch)
    n_tiles = pl.cdiv(batch, bt)
    padded = n_tiles * bt
    x_in = x if padded == batch else jnp.pad(x, ((0, padded - batch), (0, 0)))

    res, fcst = pl.pallas_call(
        _stack_kernel,
        out_shape=(jax.ShapeDtypeStruct((padded, IN_LEN), jnp.float32),
                   jax.ShapeDtypeStruct((padded, FW), jnp.float32)),
        grid=(n_tiles,),
        in_specs=[
            pl.BlockSpec((bt, IN_LEN), lambda i: (i, 0)),             # input tile
            pl.BlockSpec((N_MATS, PW, PW), lambda i: (0, 0, 0)),      # weights (resident)
            pl.BlockSpec((N_MATS, PW), lambda i: (0, 0)),             # biases  (resident)
        ],
        out_specs=(pl.BlockSpec((bt, IN_LEN), lambda i: (i, 0)),      # residual
                   pl.BlockSpec((bt, FW), lambda i: (i, 0))),         # forecast
        compiler_params=pltpu.CompilerParams(
            dimension_semantics=("parallel",)),
    )(x_in, w_packed, b_packed)

    if padded != batch:
        res = res[:batch]
        fcst = fcst[:batch]
    # same raw-memory reshape as torch's y_hat.reshape(B, target_length, nr_params)
    return res, fcst.reshape(batch, TGT_LEN, NR_PARAMS)


# ------------------------- deterministic parameters ------------------------
def _linear_init(key, fan_in, fan_out):
    """PyTorch nn.Linear default init; weight returned already (in, out)."""
    bound = 1.0 / np.sqrt(fan_in)
    kw, kb = jax.random.split(key)
    w = jax.random.uniform(kw, (fan_in, fan_out), jnp.float32, -bound, bound)
    b = jax.random.uniform(kb, (fan_out,), jnp.float32, -bound, bound)
    return w, b


def make_params(key):
    keys = jax.random.split(key, NUM_BLOCKS * (NUM_LAYERS + 4))
    ki = iter(keys)
    w_in, b_in, w_hid, b_hid = [], [], [], []
    w_bc, b_bc, w_fc, b_fc = [], [], [], []
    w_gb, b_gb, w_gf, b_gf = [], [], [], []
    for _ in range(NUM_BLOCKS):
        w, b = _linear_init(next(ki), IN_LEN, LAYER_WIDTH)
        w_in.append(w); b_in.append(b)
        wh, bh = [], []
        for _ in range(NUM_LAYERS - 1):
            w, b = _linear_init(next(ki), LAYER_WIDTH, LAYER_WIDTH)
            wh.append(w); bh.append(b)
        w_hid.append(jnp.stack(wh)); b_hid.append(jnp.stack(bh))
        w, b = _linear_init(next(ki), LAYER_WIDTH, ECD)
        w_bc.append(w); b_bc.append(b)
        w, b = _linear_init(next(ki), LAYER_WIDTH, NR_PARAMS * ECD)
        w_fc.append(w); b_fc.append(b)
        w, b = _linear_init(next(ki), ECD, IN_LEN)
        w_gb.append(w); b_gb.append(b)
        w, b = _linear_init(next(ki), ECD, TGT_LEN)
        w_gf.append(w); b_gf.append(b)
    stack = jnp.stack
    return (stack(w_in), stack(b_in), stack(w_hid), stack(b_hid),
            stack(w_bc), stack(b_bc), stack(w_fc), stack(b_fc),
            stack(w_gb), stack(b_gb), stack(w_gf), stack(b_gf))


def pack_params(params):
    """Host-side (float64) packing of all linears into 2 lane-dense arrays."""
    (w_in, b_in, w_hid, b_hid, w_bc, b_bc, w_fc, b_fc,
     w_gb, b_gb, w_gf, b_gf) = [np.asarray(p, np.float64) for p in params]
    w_list, b_list = [], []
    for blk in range(NUM_BLOCKS):
        # first FC layer, zero-padded to (PW, PW)
        w0 = np.zeros((PW, PW)); w0[:IN_LEN, :LAYER_WIDTH] = w_in[blk]
        b0 = np.zeros((PW,));    b0[:LAYER_WIDTH] = b_in[blk]
        w_list.append(w0); b_list.append(b0)
        # hidden FC layers
        for l in range(NUM_LAYERS - 1):
            wl = np.zeros((PW, PW)); wl[:LAYER_WIDTH, :LAYER_WIDTH] = w_hid[blk, l]
            bl = np.zeros((PW,));    bl[:LAYER_WIDTH] = b_hid[blk, l]
            w_list.append(wl); b_list.append(bl)
        # fused fork + generic basis
        w_back = w_bc[blk] @ w_gb[blk]                      # (LW, IN_LEN)
        b_back = b_bc[blk] @ w_gb[blk] + b_gb[blk]          # (IN_LEN,)
        bd = np.zeros((NR_PARAMS * ECD, NR_PARAMS * TGT_LEN))
        for p in range(NR_PARAMS):                          # blockdiag(w_gf,...)
            bd[p * ECD:(p + 1) * ECD, p * TGT_LEN:(p + 1) * TGT_LEN] = w_gf[blk]
        w_fore = w_fc[blk] @ bd                             # (LW, NR*TGT)
        b_fore = b_fc[blk] @ bd + np.tile(b_gf[blk], NR_PARAMS)
        wc = np.zeros((PW, PW)); bc = np.zeros((PW,))
        wc[:LAYER_WIDTH, :IN_LEN] = -w_back                 # pre-negated backcast
        wc[:LAYER_WIDTH, IN_LEN:SW] = w_fore
        bc[:IN_LEN] = -b_back
        bc[IN_LEN:SW] = b_fore
        w_list.append(wc); b_list.append(bc)
    w_packed = jnp.asarray(np.stack(w_list), jnp.float32)   # (N_MATS, PW, PW)
    b_packed = jnp.asarray(np.stack(b_list), jnp.float32)   # (N_MATS, PW)
    return w_packed, b_packed


# --------------------------- pure-JAX reference -----------------------------
def reference_forward(x, params):
    (w_in, b_in, w_hid, b_hid, w_bc, b_bc, w_fc, b_fc,
     w_gb, b_gb, w_gf, b_gf) = params
    batch = x.shape[0]
    fcst = jnp.zeros((batch, TGT_LEN, NR_PARAMS), jnp.float32)
    for blk in range(NUM_BLOCKS):
        h = jnp.maximum(jnp.dot(x, w_in[blk], precision=_PREC) + b_in[blk], 0.0)
        for l in range(NUM_LAYERS - 1):
            h = jnp.maximum(jnp.dot(h, w_hid[blk, l], precision=_PREC)
                            + b_hid[blk, l], 0.0)
        theta_b = jnp.dot(h, w_bc[blk], precision=_PREC) + b_bc[blk]
        theta_f = (jnp.dot(h, w_fc[blk], precision=_PREC)
                   + b_fc[blk]).reshape(batch, NR_PARAMS, ECD)
        x_hat = jnp.dot(theta_b, w_gb[blk], precision=_PREC) + b_gb[blk]
        y_hat = jnp.matmul(theta_f, w_gf[blk], precision=_PREC) + b_gf[blk]
        y_hat = y_hat.reshape(batch, TGT_LEN, NR_PARAMS)    # torch .reshape
        fcst = fcst + y_hat
        x = x - x_hat
    return x, fcst


# ---------------------------------- main ------------------------------------
if __name__ == "__main__":
    key = jax.random.PRNGKey(0)
    kx, kp = jax.random.split(key)
    params = make_params(kp)
    w_packed, b_packed = pack_params(params)

    # BATCH=8 is the spec-sized case (single tile, no padding);
    # batch=24 exercises the multi-tile (grid=2) + padded-last-tile path.
    for batch in (BATCH, 24):
        x = jax.random.normal(jax.random.fold_in(kx, batch),
                              (batch, IN_LEN), jnp.float32)
        res, fcst = nbeats_stack_forward(x, w_packed, b_packed)
        jax.block_until_ready((res, fcst))

        res_ref, fcst_ref = reference_forward(x, params)
        np.testing.assert_allclose(np.asarray(res), np.asarray(res_ref),
                                   rtol=1e-4, atol=1e-5)
        np.testing.assert_allclose(np.asarray(fcst), np.asarray(fcst_ref),
                                   rtol=1e-4, atol=1e-5)
        assert res.shape == (batch, IN_LEN)
        assert fcst.shape == (batch, TGT_LEN, NR_PARAMS)

    print("KERNEL_OK")
</pallas_src>

<mosaic_0001>
module attributes {stable_mosaic.version = 11 : i64} {
  func.func @_stack_kernel(%arg0: i32, %arg1: memref<8x16xf32, #tpu.memory_space<vmem>>, %arg2: memref<10x32x32xf32, #tpu.memory_space<vmem>>, %arg3: memref<10x32xf32, #tpu.memory_space<vmem>>, %arg4: memref<8x16xf32, #tpu.memory_space<vmem>>, %arg5: memref<8x16xf32, #tpu.memory_space<vmem>>) attributes {dimension_semantics = [#tpu.dimension_semantics<parallel>], iteration_bounds = array<i64: 1>, scalar_prefetch = 0 : i64, scratch_operands = 0 : i64, tpu.core_type = #tpu.core_type<tc>, window_params = [{transform_indices = @transform_0, window_bounds = array<i64: 8, 16>}, {pipeline_mode = #tpu.pipeline_mode<synchronous>, transform_indices = @transform_1, window_bounds = array<i64: 10, 32, 32>}, {pipeline_mode = #tpu.pipeline_mode<synchronous>, transform_indices = @transform_2, window_bounds = array<i64: 10, 32>}, {transform_indices = @transform_3, window_bounds = array<i64: 8, 16>}, {transform_indices = @transform_4, window_bounds = array<i64: 8, 16>}]} {
    %c0 = arith.constant 0 : index
    %c0_0 = arith.constant 0 : index
    %0 = vector.load %arg1[%c0, %c0_0] : memref<8x16xf32, #tpu.memory_space<vmem>>, vector<8x16xf32>
    %cst = arith.constant 0.000000e+00 : f32
    %1 = vector.broadcast %cst : f32 to vector<8x16xf32>
    %2 = tpu.concatenate %0, %1 in 1 : vector<8x16xf32>, vector<8x16xf32> -> vector<8x32xf32>
    %c0_1 = arith.constant 0 : index
    %c0_2 = arith.constant 0 : index
    %c0_3 = arith.constant 0 : index
    %3 = vector.load %arg2[%c0_1, %c0_2, %c0_3] : memref<10x32x32xf32, #tpu.memory_space<vmem>>, vector<1x32x32xf32>
    %4 = vector.shape_cast %3 : vector<1x32x32xf32> to vector<32x32xf32>
    %cst_4 = arith.constant dense<0.000000e+00> : vector<8x32xf32>
    %5 = tpu.matmul %2, %4, %cst_4 {dimension_numbers = #tpu.dot_dimension_numbers<[1], [0], [0], [1], [0, 0, 1, 1], [], []>, precision = #tpu.contract_precision<fp32>} : vector<8x32xf32>, vector<32x32xf32>, vector<8x32xf32> -> vector<8x32xf32>
    %c0_5 = arith.constant 0 : index
    %c0_6 = arith.constant 0 : index
    %6 = vector.load %arg3[%c0_5, %c0_6] : memref<10x32xf32, #tpu.memory_space<vmem>>, vector<1x32xf32>
    %7 = vector.broadcast %6 : vector<1x32xf32> to vector<8x32xf32>
    %8 = arith.addf %5, %7 : vector<8x32xf32>
    %cst_7 = arith.constant 0.000000e+00 : f32
    %9 = vector.broadcast %cst_7 : f32 to vector<8x32xf32>
    %10 = arith.maximumf %8, %9 : vector<8x32xf32>
    %c1 = arith.constant 1 : index
    %c0_8 = arith.constant 0 : index
    %c0_9 = arith.constant 0 : index
    %11 = vector.load %arg2[%c1, %c0_8, %c0_9] : memref<10x32x32xf32, #tpu.memory_space<vmem>>, vector<1x32x32xf32>
    %12 = vector.shape_cast %11 : vector<1x32x32xf32> to vector<32x32xf32>
    %cst_10 = arith.constant dense<0.000000e+00> : vector<8x32xf32>
    %13 = tpu.matmul %10, %12, %cst_10 {dimension_numbers = #tpu.dot_dimension_numbers<[1], [0], [0], [1], [0, 0, 1, 1], [], []>, precision = #tpu.contract_precision<fp32>} : vector<8x32xf32>, vector<32x32xf32>, vector<8x32xf32> -> vector<8x32xf32>
    %c1_11 = arith.constant 1 : index
    %c0_12 = arith.constant 0 : index
    %14 = vector.load %arg3[%c1_11, %c0_12] : memref<10x32xf32, #tpu.memory_space<vmem>>, vector<1x32xf32>
    %15 = vector.broadcast %14 : vector<1x32xf32> to vector<8x32xf32>
    %16 = arith.addf %13, %15 : vector<8x32xf32>
    %cst_13 = arith.constant 0.000000e+00 : f32
    %17 = vector.broadcast %cst_13 : f32 to vector<8x32xf32>
    %18 = arith.maximumf %16, %17 : vector<8x32xf32>
    %c2 = arith.constant 2 : index
    %c0_14 = arith.constant 0 : index
    %c0_15 = arith.constant 0 : index
    %19 = vector.load %arg2[%c2, %c0_14, %c0_15] : memref<10x32x32xf32, #tpu.memory_space<vmem>>, vector<1x32x32xf32>
    %20 = vector.shape_cast %19 : vector<1x32x32xf32> to vector<32x32xf32>
    %cst_16 = arith.constant dense<0.000000e+00> : vector<8x32xf32>
    %21 = tpu.matmul %18, %20, %cst_16 {dimension_numbers = #tpu.dot_dimension_numbers<[1], [0], [0], [1], [0, 0, 1, 1], [], []>, precision = #tpu.contract_precision<fp32>} : vector<8x32xf32>, vector<32x32xf32>, vector<8x32xf32> -> vector<8x32xf32>
    %c2_17 = arith.constant 2 : index
    %c0_18 = arith.constant 0 : index
    %22 = vector.load %arg3[%c2_17, %c0_18] : memref<10x32xf32, #tpu.memory_space<vmem>>, vector<1x32xf32>
    %23 = vector.broadcast %22 : vector<1x32xf32> to vector<8x32xf32>
    %24 = arith.addf %21, %23 : vector<8x32xf32>
    %cst_19 = arith.constant 0.000000e+00 : f32
    %25 = vector.broadcast %cst_19 : f32 to vector<8x32xf32>
    %26 = arith.maximumf %24, %25 : vector<8x32xf32>
    %c3 = arith.constant 3 : index
    %c0_20 = arith.constant 0 : index
    %c0_21 = arith.constant 0 : index
    %27 = vector.load %arg2[%c3, %c0_20, %c0_21] : memref<10x32x32xf32, #tpu.memory_space<vmem>>, vector<1x32x32xf32>
    %28 = vector.shape_cast %27 : vector<1x32x32xf32> to vector<32x32xf32>
    %cst_22 = arith.constant dense<0.000000e+00> : vector<8x32xf32>
    %29 = tpu.matmul %26, %28, %cst_22 {dimension_numbers = #tpu.dot_dimension_numbers<[1], [0], [0], [1], [0, 0, 1, 1], [], []>, precision = #tpu.contract_precision<fp32>} : vector<8x32xf32>, vector<32x32xf32>, vector<8x32xf32> -> vector<8x32xf32>
    %c3_23 = arith.constant 3 : index
    %c0_24 = arith.constant 0 : index
    %30 = vector.load %arg3[%c3_23, %c0_24] : memref<10x32xf32, #tpu.memory_space<vmem>>, vector<1x32xf32>
    %31 = vector.broadcast %30 : vector<1x32xf32> to vector<8x32xf32>
    %32 = arith.addf %29, %31 : vector<8x32xf32>
    %cst_25 = arith.constant 0.000000e+00 : f32
    %33 = vector.broadcast %cst_25 : f32 to vector<8x32xf32>
    %34 = arith.maximumf %32, %33 : vector<8x32xf32>
    %c4 = arith.constant 4 : index
    %c0_26 = arith.constant 0 : index
    %c0_27 = arith.constant 0 : index
    %35 = vector.load %arg2[%c4, %c0_26, %c0_27] : memref<10x32x32xf32, #tpu.memory_space<vmem>>, vector<1x32x32xf32>
    %36 = vector.shape_cast %35 : vector<1x32x32xf32> to vector<32x32xf32>
    %cst_28 = arith.constant dense<0.000000e+00> : vector<8x32xf32>
    %37 = tpu.matmul %34, %36, %cst_28 {dimension_numbers = #tpu.dot_dimension_numbers<[1], [0], [0], [1], [0, 0, 1, 1], [], []>, precision = #tpu.contract_precision<fp32>} : vector<8x32xf32>, vector<32x32xf32>, vector<8x32xf32> -> vector<8x32xf32>
    %c4_29 = arith.constant 4 : index
    %c0_30 = arith.constant 0 : index
    %38 = vector.load %arg3[%c4_29, %c0_30] : memref<10x32xf32, #tpu.memory_space<vmem>>, vector<1x32xf32>
    %39 = vector.broadcast %38 : vector<1x32xf32> to vector<8x32xf32>
    %40 = arith.addf %37, %39 : vector<8x32xf32>
    %41 = arith.addf %2, %40 : vector<8x32xf32>
    %c5 = arith.constant 5 : index
    %c0_31 = arith.constant 0 : index
    %c0_32 = arith.constant 0 : index
    %42 = vector.load %arg2[%c5, %c0_31, %c0_32] : memref<10x32x32xf32, #tpu.memory_space<vmem>>, vector<1x32x32xf32>
    %43 = vector.shape_cast %42 : vector<1x32x32xf32> to vector<32x32xf32>
    %cst_33 = arith.constant dense<0.000000e+00> : vector<8x32xf32>
    %44 = tpu.matmul %41, %43, %cst_33 {dimension_numbers = #tpu.dot_dimension_numbers<[1], [0], [0], [1], [0, 0, 1, 1], [], []>, precision = #tpu.contract_precision<fp32>} : vector<8x32xf32>, vector<32x32xf32>, vector<8x32xf32> -> vector<8x32xf32>
    %c5_34 = arith.constant 5 : index
    %c0_35 = arith.constant 0 : index
    %45 = vector.load %arg3[%c5_34, %c0_35] : memref<10x32xf32, #tpu.memory_space<vmem>>, vector<1x32xf32>
    %46 = vector.broadcast %45 : vector<1x32xf32> to vector<8x32xf32>
    %47 = arith.addf %44, %46 : vector<8x32xf32>
    %cst_36 = arith.constant 0.000000e+00 : f32
    %48 = vector.broadcast %cst_36 : f32 to vector<8x32xf32>
    %49 = arith.maximumf %47, %48 : vector<8x32xf32>
    %c6 = arith.constant 6 : index
    %c0_37 = arith.constant 0 : index
    %c0_38 = arith.constant 0 : index
    %50 = vector.load %arg2[%c6, %c0_37, %c0_38] : memref<10x32x32xf32, #tpu.memory_space<vmem>>, vector<1x32x32xf32>
    %51 = vector.shape_cast %50 : vector<1x32x32xf32> to vector<32x32xf32>
    %cst_39 = arith.constant dense<0.000000e+00> : vector<8x32xf32>
    %52 = tpu.matmul %49, %51, %cst_39 {dimension_numbers = #tpu.dot_dimension_numbers<[1], [0], [0], [1], [0, 0, 1, 1], [], []>, precision = #tpu.contract_precision<fp32>} : vector<8x32xf32>, vector<32x32xf32>, vector<8x32xf32> -> vector<8x32xf32>
    %c6_40 = arith.constant 6 : index
    %c0_41 = arith.constant 0 : index
    %53 = vector.load %arg3[%c6_40, %c0_41] : memref<10x32xf32, #tpu.memory_space<vmem>>, vector<1x32xf32>
    %54 = vector.broadcast %53 : vector<1x32xf32> to vector<8x32xf32>
    %55 = arith.addf %52, %54 : vector<8x32xf32>
    %cst_42 = arith.constant 0.000000e+00 : f32
    %56 = vector.broadcast %cst_42 : f32 to vector<8x32xf32>
    %57 = arith.maximumf %55, %56 : vector<8x32xf32>
    %c7 = arith.constant 7 : index
    %c0_43 = arith.constant 0 : index
    %c0_44 = arith.constant 0 : index
    %58 = vector.load %arg2[%c7, %c0_43, %c0_44] : memref<10x32x32xf32, #tpu.memory_space<vmem>>, vector<1x32x32xf32>
    %59 = vector.shape_cast %58 : vector<1x32x32xf32> to vector<32x32xf32>
    %cst_45 = arith.constant dense<0.000000e+00> : vector<8x32xf32>
    %60 = tpu.matmul %57, %59, %cst_45 {dimension_numbers = #tpu.dot_dimension_numbers<[1], [0], [0], [1], [0, 0, 1, 1], [], []>, precision = #tpu.contract_precision<fp32>} : vector<8x32xf32>, vector<32x32xf32>, vector<8x32xf32> -> vector<8x32xf32>
    %c7_46 = arith.constant 7 : index
    %c0_47 = arith.constant 0 : index
    %61 = vector.load %arg3[%c7_46, %c0_47] : memref<10x32xf32, #tpu.memory_space<vmem>>, vector<1x32xf32>
    %62 = vector.broadcast %61 : vector<1x32xf32> to vector<8x32xf32>
    %63 = arith.addf %60, %62 : vector<8x32xf32>
    %cst_48 = arith.constant 0.000000e+00 : f32
    %64 = vector.broadcast %cst_48 : f32 to vector<8x32xf32>
    %65 = arith.maximumf %63, %64 : vector<8x32xf32>
    %c8 = arith.constant 8 : index
    %c0_49 = arith.constant 0 : index
    %c0_50 = arith.constant 0 : index
    %66 = vector.load %arg2[%c8, %c0_49, %c0_50] : memref<10x32x32xf32, #tpu.memory_space<vmem>>, vector<1x32x32xf32>
    %67 = vector.shape_cast %66 : vector<1x32x32xf32> to vector<32x32xf32>
    %cst_51 = arith.constant dense<0.000000e+00> : vector<8x32xf32>
    %68 = tpu.matmul %65, %67, %cst_51 {dimension_numbers = #tpu.dot_dimension_numbers<[1], [0], [0], [1], [0, 0, 1, 1], [], []>, precision = #tpu.contract_precision<fp32>} : vector<8x32xf32>, vector<32x32xf32>, vector<8x32xf32> -> vector<8x32xf32>
    %c8_52 = arith.constant 8 : index
    %c0_53 = arith.constant 0 : index
    %69 = vector.load %arg3[%c8_52, %c0_53] : memref<10x32xf32, #tpu.memory_space<vmem>>, vector<1x32xf32>
    %70 = vector.broadcast %69 : vector<1x32xf32> to vector<8x32xf32>
    %71 = arith.addf %68, %70 : vector<8x32xf32>
    %cst_54 = arith.constant 0.000000e+00 : f32
    %72 = vector.broadcast %cst_54 : f32 to vector<8x32xf32>
    %73 = arith.maximumf %71, %72 : vector<8x32xf32>
    %c9 = arith.constant 9 : index
    %c0_55 = arith.constant 0 : index
    %c0_56 = arith.constant 0 : index
    %74 = vector.load %arg2[%c9, %c0_55, %c0_56] : memref<10x32x32xf32, #tpu.memory_space<vmem>>, vector<1x32x32xf32>
    %75 = vector.shape_cast %74 : vector<1x32x32xf32> to vector<32x32xf32>
    %cst_57 = arith.constant dense<0.000000e+00> : vector<8x32xf32>
    %76 = tpu.matmul %73, %75, %cst_57 {dimension_numbers = #tpu.dot_dimension_numbers<[1], [0], [0], [1], [0, 0, 1, 1], [], []>, precision = #tpu.contract_precision<fp32>} : vector<8x32xf32>, vector<32x32xf32>, vector<8x32xf32> -> vector<8x32xf32>
    %c9_58 = arith.constant 9 : index
    %c0_59 = arith.constant 0 : index
    %77 = vector.load %arg3[%c9_58, %c0_59] : memref<10x32xf32, #tpu.memory_space<vmem>>, vector<1x32xf32>
    %78 = vector.broadcast %77 : vector<1x32xf32> to vector<8x32xf32>
    %79 = arith.addf %76, %78 : vector<8x32xf32>
    %80 = arith.addf %41, %79 : vector<8x32xf32>
    %81 = vector.extract_strided_slice %80 {offsets = [0, 0], sizes = [8, 16], strides = [1, 1]} : vector<8x32xf32> to vector<8x16xf32>
    %c0_60 = arith.constant 0 : index
    %c0_61 = arith.constant 0 : index
    %82 = vector.load %arg4[%c0_60, %c0_61] : memref<8x16xf32, #tpu.memory_space<vmem>>, vector<8x16xf32>
    tpu.vector_store %arg4[%c0_60, %c0_61], %81 {strides = array<i32>} : memref<8x16xf32, #tpu.memory_space<vmem>>, vector<8x16xf32>,
    %83 = vector.extract_strided_slice %80 {offsets = [0, 16], sizes = [8, 16], strides = [1, 1]} : vector<8x32xf32> to vector<8x16xf32>
    %c0_62 = arith.constant 0 : index
    %c0_63 = arith.constant 0 : index
    %84 = vector.load %arg5[%c0_62, %c0_63] : memref<8x16xf32, #tpu.memory_space<vmem>>, vector<8x16xf32>
    tpu.vector_store %arg5[%c0_62, %c0_63], %83 {strides = array<i32>} : memref<8x16xf32, #tpu.memory_space<vmem>>, vector<8x16xf32>,
    return
  }
  func.func @transform_0(%arg0: i32) -> (i32, i32) {
    %c0_i32 = arith.constant 0 : i32
    %c0_i32_0 = arith.constant 0 : i32
    return %arg0, %c0_i32 : i32, i32
  }
  func.func @transform_1(%arg0: i32) -> (i32, i32, i32) {
    %c0_i32 = arith.constant 0 : i32
    %c0_i32_0 = arith.constant 0 : i32
    %c0_i32_1 = arith.constant 0 : i32
    %c0_i32_2 = arith.constant 0 : i32
    return %c0_i32, %c0_i32_0, %c0_i32_1 : i32, i32, i32
  }
  func.func @transform_2(%arg0: i32) -> (i32, i32) {
    %c0_i32 = arith.constant 0 : i32
    %c0_i32_0 = arith.constant 0 : i32
    %c0_i32_1 = arith.constant 0 : i32
    return %c0_i32, %c0_i32_0 : i32, i32
  }
  func.func @transform_3(%arg0: i32) -> (i32, i32) {
    %c0_i32 = arith.constant 0 : i32
    %c0_i32_0 = arith.constant 0 : i32
    return %arg0, %c0_i32 : i32, i32
  }
  func.func @transform_4(%arg0: i32) -> (i32, i32) {
    %c0_i32 = arith.constant 0 : i32
    %c0_i32_0 = arith.constant 0 : i32
    return %arg0, %c0_i32 : i32, i32
  }
}

</mosaic_0001>

<bundles_post_ra>
// kernel: nbeats_stack_forward.1
= control target key start
LH: loop header
LB: loop body
LE: loop exit
PB: predicated region body
PF: predicated region fallthrough
CT: control target
= control target key end

     0   :  { %10 = vsyncpa [#allocation3], 0  ;;  %s2240_s0 = inlined_call_operand.hbm [shape: f32[8,16], index: 0, kind: input, shape index: {}]   ;;  %s2241_s1 = inlined_call_operand.hbm [shape: f32[10,32,32], index: 1, kind: input, shape index: {}]   ;;  %s2242_s2 = inlined_call_operand.hbm [shape: f32[10,32], index: 2, kind: input, shape index: {}]   ;;  %s2243_s3 = inlined_call_operand.hbm [shape: f32[8,16], index: 3, kind: output, shape index: {0}]   ;;  %s2244_s4 = inlined_call_operand.vmem [shape: f32[8,16], index: 4, kind: output, shape index: {1}]  }
   0x1   :  { %11 = vsyncpa [#allocation6], 0  ;;  %s28_s17 = sshll.u32 %s2241_s1, 4  ;;  %s29_s17 = int_to_ptr.hbm [resolvable:$true] %s28_s17 }
   0x2   :  { %12 = vsyncpa [#allocation4], 0  ;;  %s2172_s18 = smov [#allocation5]   ;;  %s18_s22 = sshll.u32 %s2240_s0, 4  ;;  %s19_s22 = int_to_ptr.hbm [resolvable:$true] %s18_s22 }
   0x3   :  { %s30_s19 = sshll.u32 %s2172_s18, 4  ;;  %s2173_s23 = smov 128   ;;  %s31_s19 = int_to_ptr.vmem [resolvable:$true] %s30_s19 }
   0x4   :  { %s2174_s24 = smov 8   ;;  %s2175_s25 = smov [#allocation2]  }
   0x5   :  { %36 = dma.hbm_to_vmem [thread:$0]  %s29_s17, 5120, %s31_s19, [#allocation6], %s2173_s23, %s2173_s23, %s2174_s24  }
   0x6   :  { %s20_s26 = sshll.u32 %s2175_s25, 4  ;;  %s41_s29 = sshll.u32 %s2242_s2, 4  ;;  %s21_s26 = int_to_ptr.vmem [resolvable:$true] %s20_s26  ;;  %s42_s29 = int_to_ptr.hbm [resolvable:$true] %s41_s29 }
   0x7   :  { %23 = dma.hbm_to_vmem [thread:$0]  %s19_s22, 128, %s21_s26, [#allocation3]  }
   0x8   :  { %s2176_s1 = smov [#allocation7]  }
   0x9   :  { %s43_s30 = sshll.u32 %s2176_s1, 4  ;;  %s44_s30 = int_to_ptr.vmem [resolvable:$true] %s43_s30 }
   0xa   :  { %49 = dma.hbm_to_vmem [thread:$0]  %s42_s29, 256, %s44_s30, [#allocation6], %s2173_s23, %s2173_s23, %s2174_s24  }
   0xb   :  { %2166 = dma.done.wait [#allocation3], 128  }
   0xc   :  { %2167 = vsyncadd [#allocation3], 4294967168 }
   0xd   :  { %2168 = dma.done.wait [#allocation6], 5376  }
   0xe   :  { %2169 = vsyncadd [#allocation6], 4294961920  ;;  %vm63_vm0 = vcmask 130048   ;;  %v68_v0 = vld [vmem:[#allocation5 + $0x18] sm:$0xff]  ;;  %v67_v1 = vld [vmem:[#allocation5 + $0x10] sm:$0xff]  ;;  %vm71_vm1 = vcmask 261120  }
   0xf   :  { %v66_v2 = vld [vmem:[#allocation5 + $0x8] sm:$0xff]  ;;  %v87_v3 = vand.u32 4294901760, %v68_v0  ;;  %v89_v4 = vand.u32 4294901760, %v67_v1  ;;  %v65_v6 = vld [vmem:[#allocation5] sm:$0xff]  ;;  %v62_v7 = vld [vmem:[#allocation2] sm:$0xff]  ;;  %s2177_s0 = smov [#allocation8]  }
  0x10   :  { %v91_v5 = vand.u32 4294901760, %v66_v2  ;;  %v93_v8 = vand.u32 4294901760, %v65_v6  ;;  %v2214_v9 = vsel %vm63_vm0, %v62_v7, 0.0  ;;  %v265_v32 = vld [vmem:[#allocation5 + $0x38] sm:$0xff]  ;;  %v264_v34 = vld [vmem:[#allocation5 + $0x30] sm:$0xff]  ;;  %v263_v37 = vld [vmem:[#allocation5 + $0x28] sm:$0xff] }
  0x11   :  { %v117_v10 = vsub.f32 %v68_v0, %v87_v3  ;;  %88 = vmatpush.msra.mxu0 %v87_v3  ;;  %v123_v11 = vsub.f32 %v67_v1, %v89_v4  ;;  %188 = vmatpush.msra.mxu3 %v87_v3  ;;  %v73_v13 = vsel %vm71_vm1, %v2214_v9, 0  ;;  %v283_v33 = vand.u32 4294901760, %v265_v32  ;;  %v262_v41 = vld [vmem:[#allocation5 + $0x20] sm:$0xff]  ;;  %s2036_s2 = sshll.u32 %s2177_s0, 4  ;;  %s2038_s7 = sshll.u32 %s2243_s3, 4  ;;  %s2037_s2 = int_to_ptr.vmem [resolvable:$true] %s2036_s2  ;;  %s2039_s7 = int_to_ptr.hbm [resolvable:$true] %s2038_s7 }
  0x12   :  { %v129_v12 = vsub.f32 %v66_v2, %v91_v5  ;;  %v135_v14 = vsub.f32 %v65_v6, %v93_v8  ;;  %v95_v15 = vand.u32 4294901760, %v73_v13  ;;  %v285_v36 = vand.u32 4294901760, %v264_v34  ;;  %v2060_v56 = vld [vmem:[#allocation7] ss:$0 sm:$0xff]  ;;  %s2178_s8 = smov 112  }
  0x13   :  { %159 = vmatpush.msra.mxu2 %v117_v10  ;;  %90 = vmatpush.msra.mxu0 %v89_v4  ;;  %v118_v16 = vand.u32 4294901760, %v117_v10  ;;  %v124_v17 = vand.u32 4294901760, %v123_v11  ;;  %v313_v35 = vsub.f32 %v265_v32, %v283_v33  ;;  %v287_v40 = vand.u32 4294901760, %v263_v37 }
  0x14   :  { %v130_v18 = vand.u32 4294901760, %v129_v12  ;;  %190 = vmatpush.msra.mxu3 %v89_v4  ;;  %v96_v19 = vsub.f32 %v73_v13, %v95_v15  ;;  %v136_v20 = vand.u32 4294901760, %v135_v14  ;;  %v319_v39 = vsub.f32 %v264_v34, %v285_v36  ;;  %v461_v13 = vld [vmem:[#allocation5 + $0x58] sm:$0xff] }
  0x15   :  { %162 = vmatpush.msra.mxu2 %v123_v11  ;;  %v119_v21 = vsub.f32 %v117_v10, %v118_v16  ;;  %92 = vmatpush.msra.mxu0 %v91_v5  ;;  %v125_v22 = vsub.f32 %v123_v11, %v124_v17  ;;  %v314_v38 = vand.u32 4294901760, %v313_v35  ;;  %v325_v44 = vsub.f32 %v263_v37, %v287_v40  ;;  %v2061_v37 = vld [vmem:[#allocation7 + $0x1] ss:$0 sm:$0xff] }
  0x16   :  { %v131_v23 = vsub.f32 %v129_v12, %v130_v18  ;;  %192 = vmatpush.msra.mxu3 %v91_v5  ;;  %v97_v24 = vand.u32 4294901760, %v96_v19  ;;  %v137_v27 = vsub.f32 %v135_v14, %v136_v20  ;;  %v320_v43 = vand.u32 4294901760, %v319_v39 }
  0x17   :  { %v120_v25 = vand.u32 4294901760, %v119_v21  ;;  %165 = vmatpush.msra.mxu2 %v129_v12  ;;  %v126_v26 = vand.u32 4294901760, %v125_v22  ;;  %94 = vmatpush.msra.mxu0 %v93_v8  ;;  %v315_v42 = vsub.f32 %v313_v35, %v314_v38  ;;  %v289_v45 = vand.u32 4294901760, %v262_v41  ;;  %v458_v22 = vld [vmem:[#allocation5 + $0x40] sm:$0xff] }
  0x18   :  { %194 = vmatpush.msra.mxu3 %v93_v8  ;;  %v98_v28 = vsub.f32 %v96_v19, %v97_v24  ;;  %v132_v29 = vand.u32 4294901760, %v131_v23  ;;  %v138_v31 = vand.u32 4294901760, %v137_v27  ;;  %v321_v47 = vsub.f32 %v319_v39, %v320_v43 }
  0x19   :  { %217 = vmatpush.msrb.mxu0 %v118_v16  ;;  %121 = vmatpush.msra.mxu1 %v120_v25  ;;  %v316_v46 = vand.u32 4294901760, %v315_v42  ;;  %v326_v48 = vand.u32 4294901760, %v325_v44  ;;  %v331_v49 = vsub.f32 %v262_v41, %v289_v45 }
  0x1a   :  { %168 = vmatpush.msra.mxu2 %v135_v14  ;;  %v99_v30 = vand.u32 4294901760, %v98_v28  ;;  %198 = vmatmul.f32.vlgmr.msra.gmra.mxu3 %v97_v24  ;;  %v322_v50 = vand.u32 4294901760, %v321_v47  ;;  %v479_v14 = vand.u32 4294901760, %v461_v13 }
  0x1b   :  { %171 = vmatmul.f32.vlgmr.msra.gmra.mxu2 %v96_v19  ;;  %127 = vmatpush.msra.mxu1 %v126_v26  ;;  %v327_v51 = vsub.f32 %v325_v44, %v326_v48  ;;  %v332_v52 = vand.u32 4294901760, %v331_v49  ;;  %v485_v26 = vand.u32 4294901760, %v458_v22 }
  0x1c   :  { %221 = vmatpush.msrb.mxu0 %v124_v17  ;;  %284 = vmatpush.msrb.mxu2 %v283_v33  ;;  %v509_v16 = vsub.f32 %v461_v13, %v479_v14 }
  0x1d   :  { %100 = vmatmul.f32.vlgmr.msra.gmra.mxu0 %v99_v30  ;;  %133 = vmatpush.msra.mxu1 %v132_v29  ;;  %v328_v53 = vand.u32 4294901760, %v327_v51  ;;  %v333_v54 = vsub.f32 %v331_v49, %v332_v52  ;;  %v527_v30 = vsub.f32 %v458_v22, %v485_v26 }
  0x1e   :  { %225 = vmatpush.msrb.mxu0 %v130_v18  ;;  %286 = vmatpush.msrb.mxu2 %v285_v36  ;;  %v459_v18 = vld [vmem:[#allocation5 + $0x48] sm:$0xff]  ;;  %v510_v19 = vand.u32 4294901760, %v509_v16 }
  0x1f   :  { %139 = vmatpush.msra.mxu1 %v138_v31  ;;  %317 = vmatpush.msrb.mxu3 %v316_v46  ;;  %v334_v55 = vand.u32 4294901760, %v333_v54  ;;  %v483_v21 = vand.u32 4294901760, %v459_v18 }
  0x20   :  { %229 = vmatpush.msrb.mxu0 %v136_v20  ;;  %141 = vmatmul.f32.vlgmr.msra.gmra.mxu1 %v95_v15  ;;  %v511_v23 = vsub.f32 %v509_v16, %v510_v19 }
  0x21   :  { %248 = vmatpush.msrb.mxu1 %v87_v3  ;;  %288 = vmatpush.msrb.mxu2 %v287_v40  ;;  %v521_v25 = vsub.f32 %v459_v18, %v483_v21  ;;  %v2062_v18 = vld [vmem:[#allocation7 + $0x2] ss:$0 sm:$0xff] }
  0x22   :  { %355 = vmatpush.msra.mxu0 %v313_v35  ;;  %323 = vmatpush.msrb.mxu3 %v322_v50  ;;  %v512_v27 = vand.u32 4294901760, %v511_v23 }
  0x23   :  { %250 = vmatpush.msrb.mxu1 %v89_v4  ;;  %290 = vmatpush.msrb.mxu2 %v289_v45  ;;  %v522_v29 = vand.u32 4294901760, %v521_v25 }
  0x24   :  { %358 = vmatpush.msra.mxu0 %v319_v39  ;;  %329 = vmatpush.msrb.mxu3 %v328_v53 }
  0x25   :  { %231 = vmatmul.f32.vlgmr.msrb.gmra.mxu0 %v95_v15  ;;  %252 = vmatpush.msrb.mxu1 %v91_v5  ;;  %v523_v32 = vsub.f32 %v521_v25, %v522_v29 }
  0x26   :  { %361 = vmatpush.msra.mxu0 %v325_v44  ;;  %413 = vmatpush.msra.mxu2 %v314_v38 }
  0x27   :  { %254 = vmatpush.msrb.mxu1 %v93_v8  ;;  %335 = vmatpush.msrb.mxu3 %v334_v55  ;;  %v524_v34 = vand.u32 4294901760, %v523_v32 }
  0x28   :  { %256 = vmatmul.f32.vlgmr.msrb.gmra.mxu1 %v95_v15  ;;  %364 = vmatpush.msra.mxu0 %v331_v49  ;;  %v460_v15 = vld [vmem:[#allocation5 + $0x50] sm:$0xff] }
  0x29   :  { %384 = vmatpush.msra.mxu1 %v283_v33  ;;  %417 = vmatpush.msra.mxu2 %v320_v43  ;;  %v481_v17 = vand.u32 4294901760, %v460_v15 }
  0x2a   :  { %444 = vmatpush.msra.mxu3 %v283_v33  ;;  %480 = vmatpush.msrb.mxu0 %v479_v14  ;;  %v528_v33 = vand.u32 4294901760, %v527_v30 }
  0x2b   :  { %386 = vmatpush.msra.mxu1 %v285_v36  ;;  %421 = vmatpush.msra.mxu2 %v326_v48  ;;  %v515_v20 = vsub.f32 %v460_v15, %v481_v17 }
  0x2c   :  { %446 = vmatpush.msra.mxu3 %v285_v36  ;;  %482 = vmatpush.msrb.mxu0 %v481_v17  ;;  %v529_v35 = vsub.f32 %v527_v30, %v528_v33 }
  0x2d   :  { %388 = vmatpush.msra.mxu1 %v287_v40  ;;  %425 = vmatpush.msra.mxu2 %v332_v52  ;;  %v516_v24 = vand.u32 4294901760, %v515_v20 }
  0x2e   :  { %448 = vmatpush.msra.mxu3 %v287_v40  ;;  %484 = vmatpush.msrb.mxu0 %v483_v21  ;;  %v530_v36 = vand.u32 4294901760, %v529_v35 }
  0x2f   :  { %390 = vmatpush.msra.mxu1 %v289_v45  ;;  %v517_v28 = vsub.f32 %v515_v20, %v516_v24 }
  0x30   :  { %450 = vmatpush.msra.mxu3 %v289_v45  ;;  %486 = vmatpush.msrb.mxu0 %v485_v26 }
  0x31   :  { %513 = vmatpush.msrb.mxu1 %v512_v27  ;;  %v518_v31 = vand.u32 4294901760, %v517_v28 }
  0x33   :  { %519 = vmatpush.msrb.mxu1 %v518_v31 }
  0x35   :  { %525 = vmatpush.msrb.mxu1 %v524_v34 }
  0x37   :  { %531 = vmatpush.msrb.mxu1 %v530_v36 }
  0x9a   :  { %v101_v57 = vpop.f32.mrf.mxu0 }
  0x9b   :  { %v102_v58 = vadd.f32 %v2060_v56, %v101_v57  ;;  %v657_v57 = vld [vmem:[#allocation5 + $0x78] sm:$0xff] }
  0x9d   :  { %v142_v59 = vpop.f32.mrf.mxu1  ;;  %v199_v62 = vpop.f32.mrf.mxu3 }
  0x9e   :  { %v172_v60 = vpop.f32.mrf.mxu2  ;;  %v143_v61 = vadd.f32 %v142_v59, %v102_v58  ;;  %v675_v58 = vand.u32 4294901760, %v657_v57  ;;  %v656_v59 = vld [vmem:[#allocation5 + $0x70] sm:$0xff] }
  0xa0   :  { %v173_v63 = vadd.f32 %v172_v60, %v143_v61  ;;  %v705_v60 = vsub.f32 %v657_v57, %v675_v58  ;;  %v677_v61 = vand.u32 4294901760, %v656_v59 }
  0xa2   :  { %v232_v0 = vpop.f32.mrf.mxu0  ;;  %v200_v1 = vadd.f32 %v199_v62, %v173_v63  ;;  %v655_v62 = vld [vmem:[#allocation5 + $0x68] sm:$0xff]  ;;  %v706_v63 = vand.u32 4294901760, %v705_v60 }
  0xa4   :  { %v233_v2 = vadd.f32 %v232_v0, %v200_v1  ;;  %v711_v0 = vsub.f32 %v656_v59, %v677_v61  ;;  %v679_v1 = vand.u32 4294901760, %v655_v62 }
  0xa5   :  { %v257_v3 = vpop.f32.mrf.mxu1 }
  0xa6   :  { %v258_v4 = vadd.f32 %v257_v3, %v233_v2  ;;  %v654_v2 = vld [vmem:[#allocation5 + $0x60] sm:$0xff]  ;;  %v707_v3 = vsub.f32 %v705_v60, %v706_v63 }
  0xa8   :  { %v260_v5 = vmax.f32 %v258_v4, 0.0  ;;  %v712_v4 = vand.u32 4294901760, %v711_v0 }
  0xaa   :  { %v269_v6 = vsel %vm71_vm1, %v260_v5, 0  ;;  %v717_v5 = vsub.f32 %v655_v62, %v679_v1  ;;  %v2063_v62 = vld [vmem:[#allocation7 + $0x3] ss:$0 sm:$0xff] }
  0xab   :  { %v291_v7 = vand.u32 4294901760, %v269_v6 }
  0xad   :  { %v292_v8 = vsub.f32 %v269_v6, %v291_v7  ;;  %337 = vmatmul.f32.vlgmr.msrb.gmra.mxu3 %v291_v7  ;;  %v681_v6 = vand.u32 4294901760, %v654_v2 }
  0xae   :  { %580 = vmatpush.msrb.mxu3 %v479_v14 }
  0xaf   :  { %367 = vmatmul.f32.vlgmr.msra.gmra.mxu0 %v292_v8  ;;  %v293_v10 = vand.u32 4294901760, %v292_v8 }
  0xb0   :  { %582 = vmatpush.msrb.mxu3 %v481_v17  ;;  %609 = vmatpush.msra.mxu0 %v510_v19 }
  0xb1   :  { %394 = vmatmul.f32.vlgmr.msra.gmra.mxu1 %v293_v10  ;;  %v294_v11 = vsub.f32 %v292_v8, %v293_v10  ;;  %v713_v8 = vsub.f32 %v711_v0, %v712_v4  ;;  %v718_v10 = vand.u32 4294901760, %v717_v5 }
  0xb2   :  { %584 = vmatpush.msrb.mxu3 %v483_v21  ;;  %613 = vmatpush.msra.mxu0 %v516_v24 }
  0xb3   :  { %v295_v12 = vand.u32 4294901760, %v294_v11  ;;  %640 = vmatpush.msra.mxu1 %v479_v14  ;;  %v723_v11 = vsub.f32 %v654_v2, %v681_v6  ;;  %v719_v13 = vsub.f32 %v717_v5, %v718_v10 }
  0xb4   :  { %586 = vmatpush.msrb.mxu3 %v485_v26  ;;  %617 = vmatpush.msra.mxu0 %v522_v29 }
  0xb5   :  { %296 = vmatmul.f32.vlgmr.msrb.gmra.mxu2 %v295_v12  ;;  %452 = vmatmul.f32.vlgmr.msra.gmra.mxu3 %v291_v7  ;;  %v714_v12 = vand.u32 4294901760, %v713_v8  ;;  %v724_v14 = vand.u32 4294901760, %v723_v11  ;;  %v720_v15 = vand.u32 4294901760, %v719_v13 }
  0xb6   :  { %551 = vmatpush.msrb.mxu2 %v509_v16  ;;  %621 = vmatpush.msra.mxu0 %v528_v33 }
  0xb7   :  { %642 = vmatpush.msra.mxu1 %v481_v17  ;;  %v725_v16 = vsub.f32 %v723_v11, %v724_v14 }
  0xb8   :  { %554 = vmatpush.msrb.mxu2 %v515_v20 }
  0xb9   :  { %644 = vmatpush.msra.mxu1 %v483_v21  ;;  %v726_v17 = vand.u32 4294901760, %v725_v16 }
  0xba   :  { %557 = vmatpush.msrb.mxu2 %v521_v25 }
  0xbb   :  { %646 = vmatpush.msra.mxu1 %v485_v26 }
  0xbc   :  { %560 = vmatpush.msrb.mxu2 %v527_v30 }
  0xbd   :  { %427 = vmatmul.f32.vlgmr.msra.gmra.mxu2 %v291_v7  ;;  %v708_v7 = vand.u32 4294901760, %v707_v3 }
  0xbe   :  { %676 = vmatpush.msra.mxu2 %v675_v58 }
  0xbf   :  { %709 = vmatpush.msra.mxu3 %v708_v7 }
  0xc0   :  { %678 = vmatpush.msra.mxu2 %v677_v61 }
  0xc1   :  { %715 = vmatpush.msra.mxu3 %v714_v12 }
  0xc2   :  { %680 = vmatpush.msra.mxu2 %v679_v1 }
  0xc3   :  { %721 = vmatpush.msra.mxu3 %v720_v15 }
  0xc4   :  { %682 = vmatpush.msra.mxu2 %v681_v6 }
  0xc5   :  { %727 = vmatpush.msra.mxu3 %v726_v17 }
 0x12c   :  { %v368_v42 = vpop.f32.mrf.mxu0 }
 0x12e   :  { %v395_v44 = vpop.f32.mrf.mxu1 }
 0x130   :  { %v338_v38 = vpop.f32.mrf.mxu3 }
 0x138   :  { %v297_v39 = vpop.f32.mrf.mxu2  ;;  %v453_v48 = vpop.f32.mrf.mxu3 }
 0x139   :  { %v298_v40 = vadd.f32 %v2061_v37, %v297_v39 }
 0x13b   :  { %v339_v41 = vadd.f32 %v338_v38, %v298_v40  ;;  %v853_v38 = vld [vmem:[#allocation5 + $0x98] sm:$0xff]  ;;  %v852_v40 = vld [vmem:[#allocation5 + $0x90] sm:$0xff] }
 0x13c   :  { %v871_v39 = vand.u32 4294901760, %v853_v38 }
 0x13d   :  { %v369_v43 = vadd.f32 %v368_v42, %v339_v41  ;;  %v873_v42 = vand.u32 4294901760, %v852_v40 }
 0x13e   :  { %v901_v41 = vsub.f32 %v853_v38, %v871_v39 }
 0x13f   :  { %v396_v45 = vadd.f32 %v395_v44, %v369_v43  ;;  %v851_v43 = vld [vmem:[#allocation5 + $0x88] sm:$0xff] }
 0x140   :  { %v428_v46 = vpop.f32.mrf.mxu2  ;;  %v902_v44 = vand.u32 4294901760, %v901_v41 }
 0x141   :  { %v429_v47 = vadd.f32 %v428_v46, %v396_v45  ;;  %v907_v45 = vsub.f32 %v852_v40, %v873_v42  ;;  %v875_v46 = vand.u32 4294901760, %v851_v43 }
 0x143   :  { %v454_v49 = vadd.f32 %v453_v48, %v429_v47  ;;  %v850_v47 = vld [vmem:[#allocation5 + $0x80] sm:$0xff]  ;;  %v903_v48 = vsub.f32 %v901_v41, %v902_v44 }
 0x145   :  { %v456_v50 = vmax.f32 %v454_v49, 0.0  ;;  %v908_v49 = vand.u32 4294901760, %v907_v45 }
 0x147   :  { %v465_v51 = vsel %vm71_vm1, %v456_v50, 0  ;;  %v913_v50 = vsub.f32 %v851_v43, %v875_v46  ;;  %v2064_v43 = vld [vmem:[#allocation7 + $0x4] ss:$0 sm:$0xff] }
 0x148   :  { %v487_v52 = vand.u32 4294901760, %v465_v51 }
 0x14a   :  { %v488_v53 = vsub.f32 %v465_v51, %v487_v52  ;;  %533 = vmatmul.f32.vlgmr.msrb.gmra.mxu1 %v487_v52  ;;  %v877_v51 = vand.u32 4294901760, %v850_v47 }
 0x14b   :  { %776 = vmatpush.msrb.mxu1 %v675_v58 }
 0x14c   :  { %563 = vmatmul.f32.vlgmr.msrb.gmra.mxu2 %v488_v53  ;;  %v489_v54 = vand.u32 4294901760, %v488_v53 }
 0x14d   :  { %778 = vmatpush.msrb.mxu1 %v677_v61  ;;  %805 = vmatpush.msrb.mxu2 %v706_v63 }
 0x14e   :  { %590 = vmatmul.f32.vlgmr.msrb.gmra.mxu3 %v489_v54  ;;  %v490_v55 = vsub.f32 %v488_v53, %v489_v54  ;;  %v909_v53 = vsub.f32 %v907_v45, %v908_v49  ;;  %v914_v54 = vand.u32 4294901760, %v913_v50 }
 0x14f   :  { %780 = vmatpush.msrb.mxu1 %v679_v1  ;;  %809 = vmatpush.msrb.mxu2 %v712_v4 }
 0x150   :  { %v491_v56 = vand.u32 4294901760, %v490_v55  ;;  %836 = vmatpush.msrb.mxu3 %v675_v58  ;;  %v919_v55 = vsub.f32 %v850_v47, %v877_v51  ;;  %v915_v57 = vsub.f32 %v913_v50, %v914_v54 }
 0x151   :  { %782 = vmatpush.msrb.mxu1 %v681_v6  ;;  %813 = vmatpush.msrb.mxu2 %v718_v10 }
 0x152   :  { %492 = vmatmul.f32.vlgmr.msrb.gmra.mxu0 %v491_v56  ;;  %648 = vmatmul.f32.vlgmr.msra.gmra.mxu1 %v487_v52  ;;  %v910_v56 = vand.u32 4294901760, %v909_v53  ;;  %v920_v58 = vand.u32 4294901760, %v919_v55  ;;  %v916_v59 = vand.u32 4294901760, %v915_v57 }
 0x153   :  { %747 = vmatpush.msrb.mxu0 %v705_v60  ;;  %817 = vmatpush.msrb.mxu2 %v724_v14 }
 0x154   :  { %838 = vmatpush.msrb.mxu3 %v677_v61  ;;  %v921_v60 = vsub.f32 %v919_v55, %v920_v58 }
 0x155   :  { %750 = vmatpush.msrb.mxu0 %v711_v0 }
 0x156   :  { %840 = vmatpush.msrb.mxu3 %v679_v1  ;;  %v922_v61 = vand.u32 4294901760, %v921_v60 }
 0x157   :  { %753 = vmatpush.msrb.mxu0 %v717_v5 }
 0x158   :  { %842 = vmatpush.msrb.mxu3 %v681_v6 }
 0x159   :  { %756 = vmatpush.msrb.mxu0 %v723_v11 }
 0x15a   :  { %623 = vmatmul.f32.vlgmr.msra.gmra.mxu0 %v487_v52  ;;  %v904_v52 = vand.u32 4294901760, %v903_v48 }
 0x15b   :  { %872 = vmatpush.msra.mxu0 %v871_v39 }
 0x15c   :  { %905 = vmatpush.msra.mxu1 %v904_v52 }
 0x15d   :  { %874 = vmatpush.msra.mxu0 %v873_v42 }
 0x15e   :  { %911 = vmatpush.msra.mxu1 %v910_v56 }
 0x15f   :  { %876 = vmatpush.msra.mxu0 %v875_v46 }
 0x160   :  { %917 = vmatpush.msra.mxu1 %v916_v59 }
 0x161   :  { %878 = vmatpush.msra.mxu0 %v877_v51 }
 0x162   :  { %923 = vmatpush.msra.mxu1 %v922_v61 }
 0x1c7   :  { %v534_v19 = vpop.f32.mrf.mxu1 }
 0x1cf   :  { %v493_v20 = vpop.f32.mrf.mxu0  ;;  %v564_v23 = vpop.f32.mrf.mxu2 }
 0x1d0   :  { %v494_v21 = vadd.f32 %v2062_v18, %v493_v20  ;;  %v649_v29 = vpop.f32.mrf.mxu1 }
 0x1d1   :  { %v591_v25 = vpop.f32.mrf.mxu3 }
 0x1d2   :  { %v535_v22 = vadd.f32 %v534_v19, %v494_v21  ;;  %v1049_v19 = vld [vmem:[#allocation5 + $0xb8] sm:$0xff]  ;;  %v1048_v21 = vld [vmem:[#allocation5 + $0xb0] sm:$0xff] }
 0x1d3   :  { %v1067_v20 = vand.u32 4294901760, %v1049_v19 }
 0x1d4   :  { %v565_v24 = vadd.f32 %v564_v23, %v535_v22  ;;  %v1069_v23 = vand.u32 4294901760, %v1048_v21 }
 0x1d5   :  { %v1097_v22 = vsub.f32 %v1049_v19, %v1067_v20 }
 0x1d6   :  { %v592_v26 = vadd.f32 %v591_v25, %v565_v24  ;;  %v1047_v24 = vld [vmem:[#allocation5 + $0xa8] sm:$0xff] }
 0x1d7   :  { %v624_v27 = vpop.f32.mrf.mxu0  ;;  %v1098_v25 = vand.u32 4294901760, %v1097_v22 }
 0x1d8   :  { %v625_v28 = vadd.f32 %v624_v27, %v592_v26  ;;  %v1103_v26 = vsub.f32 %v1048_v21, %v1069_v23  ;;  %v1071_v27 = vand.u32 4294901760, %v1047_v24 }
 0x1da   :  { %v650_v30 = vadd.f32 %v649_v29, %v625_v28  ;;  %v1046_v28 = vld [vmem:[#allocation5 + $0xa0] sm:$0xff]  ;;  %v1099_v29 = vsub.f32 %v1097_v22, %v1098_v25 }
 0x1dc   :  { %v652_v31 = vmax.f32 %v650_v30, 0.0  ;;  %v1104_v30 = vand.u32 4294901760, %v1103_v26 }
 0x1de   :  { %v661_v32 = vsel %vm71_vm1, %v652_v31, 0  ;;  %v1109_v31 = vsub.f32 %v1047_v24, %v1071_v27 }
 0x1df   :  { %v683_v33 = vand.u32 4294901760, %v661_v32 }
 0x1e1   :  { %v684_v34 = vsub.f32 %v661_v32, %v683_v33  ;;  %729 = vmatmul.f32.vlgmr.msra.gmra.mxu3 %v683_v33  ;;  %v1073_v32 = vand.u32 4294901760, %v1046_v28 }
 0x1e2   :  { %972 = vmatpush.msra.mxu3 %v871_v39 }
 0x1e3   :  { %759 = vmatmul.f32.vlgmr.msrb.gmra.mxu0 %v684_v34  ;;  %v685_v35 = vand.u32 4294901760, %v684_v34 }
 0x1e4   :  { %974 = vmatpush.msra.mxu3 %v873_v42  ;;  %1001 = vmatpush.msrb.mxu0 %v902_v44 }
 0x1e5   :  { %786 = vmatmul.f32.vlgmr.msrb.gmra.mxu1 %v685_v35  ;;  %v686_v36 = vsub.f32 %v684_v34, %v685_v35  ;;  %v1105_v34 = vsub.f32 %v1103_v26, %v1104_v30  ;;  %v1110_v35 = vand.u32 4294901760, %v1109_v31 }
 0x1e6   :  { %976 = vmatpush.msra.mxu3 %v875_v46  ;;  %1005 = vmatpush.msrb.mxu0 %v908_v49 }
 0x1e7   :  { %v687_v37 = vand.u32 4294901760, %v686_v36  ;;  %1032 = vmatpush.msrb.mxu1 %v871_v39  ;;  %v1115_v36 = vsub.f32 %v1046_v28, %v1073_v32  ;;  %v1111_v38 = vsub.f32 %v1109_v31, %v1110_v35 }
 0x1e8   :  { %978 = vmatpush.msra.mxu3 %v877_v51  ;;  %1009 = vmatpush.msrb.mxu0 %v914_v54 }
 0x1e9   :  { %688 = vmatmul.f32.vlgmr.msra.gmra.mxu2 %v687_v37  ;;  %844 = vmatmul.f32.vlgmr.msrb.gmra.mxu3 %v683_v33  ;;  %v1106_v37 = vand.u32 4294901760, %v1105_v34  ;;  %v1116_v39 = vand.u32 4294901760, %v1115_v36  ;;  %v1112_v40 = vand.u32 4294901760, %v1111_v38 }
 0x1ea   :  { %943 = vmatpush.msra.mxu2 %v901_v41  ;;  %1013 = vmatpush.msrb.mxu0 %v920_v58 }
 0x1eb   :  { %1034 = vmatpush.msrb.mxu1 %v873_v42  ;;  %v1117_v41 = vsub.f32 %v1115_v36, %v1116_v39 }
 0x1ec   :  { %946 = vmatpush.msra.mxu2 %v907_v45 }
 0x1ed   :  { %1036 = vmatpush.msrb.mxu1 %v875_v46  ;;  %v1118_v42 = vand.u32 4294901760, %v1117_v41 }
 0x1ee   :  { %949 = vmatpush.msra.mxu2 %v913_v50 }
 0x1ef   :  { %1038 = vmatpush.msrb.mxu1 %v877_v51 }
 0x1f0   :  { %952 = vmatpush.msra.mxu2 %v919_v55 }
 0x1f1   :  { %819 = vmatmul.f32.vlgmr.msrb.gmra.mxu2 %v683_v33  ;;  %v1100_v33 = vand.u32 4294901760, %v1099_v29 }
 0x1f2   :  { %1068 = vmatpush.msrb.mxu2 %v1067_v20 }
 0x1f3   :  { %1101 = vmatpush.msrb.mxu3 %v1100_v33 }
 0x1f4   :  { %1070 = vmatpush.msrb.mxu2 %v1069_v23 }
 0x1f5   :  { %1107 = vmatpush.msrb.mxu3 %v1106_v37 }
 0x1f6   :  { %1072 = vmatpush.msrb.mxu2 %v1071_v27 }
 0x1f7   :  { %1113 = vmatpush.msrb.mxu3 %v1112_v40 }
 0x1f8   :  { %1074 = vmatpush.msrb.mxu2 %v1073_v32 }
 0x1f9   :  { %1119 = vmatpush.msrb.mxu3 %v1118_v42 }
 0x260   :  { %v760_v3 = vpop.f32.mrf.mxu0 }
 0x262   :  { %v787_v5 = vpop.f32.mrf.mxu1 }
 0x264   :  { %v730_v63 = vpop.f32.mrf.mxu3 }
 0x26c   :  { %v689_v0 = vpop.f32.mrf.mxu2  ;;  %v845_v10 = vpop.f32.mrf.mxu3 }
 0x26d   :  { %v690_v1 = vadd.f32 %v2063_v62, %v689_v0 }
 0x26f   :  { %v731_v2 = vadd.f32 %v730_v63, %v690_v1  ;;  %v1245_v63 = vld [vmem:[#allocation5 + $0xd8] sm:$0xff]  ;;  %v1244_v1 = vld [vmem:[#allocation5 + $0xd0] sm:$0xff] }
 0x270   :  { %v1263_v0 = vand.u32 4294901760, %v1245_v63 }
 0x271   :  { %v761_v4 = vadd.f32 %v760_v3, %v731_v2  ;;  %v1243_v3 = vld [vmem:[#allocation5 + $0xc8] sm:$0xff] }
 0x272   :  { %v1293_v2 = vsub.f32 %v1245_v63, %v1263_v0 }
 0x273   :  { %v788_v6 = vadd.f32 %v787_v5, %v761_v4 }
 0x274   :  { %v820_v7 = vpop.f32.mrf.mxu2  ;;  %v1294_v4 = vand.u32 4294901760, %v1293_v2 }
 0x275   :  { %v821_v8 = vadd.f32 %v820_v7, %v788_v6  ;;  %v1267_v6 = vand.u32 4294901760, %v1243_v3  ;;  %v1242_v7 = vld [vmem:[#allocation5 + $0xc0] sm:$0xff] }
 0x277   :  { %v846_v11 = vadd.f32 %v845_v10, %v821_v8  ;;  %v1295_v8 = vsub.f32 %v1293_v2, %v1294_v4 }
 0x279   :  { %v848_v12 = vmax.f32 %v846_v11, 0.0  ;;  %v1305_v11 = vsub.f32 %v1243_v3, %v1267_v6  ;;  %v2066_v3 = vld [vmem:[#allocation7 + $0x6] ss:$0 sm:$0xff] }
 0x27b   :  { %v857_v13 = vsel %vm71_vm1, %v848_v12, 0  ;;  %v1269_v12 = vand.u32 4294901760, %v1242_v7 }
 0x27c   :  { %v879_v14 = vand.u32 4294901760, %v857_v13 }
 0x27e   :  { %v880_v15 = vsub.f32 %v857_v13, %v879_v14  ;;  %925 = vmatmul.f32.vlgmr.msra.gmra.mxu1 %v879_v14  ;;  %v1296_v13 = vand.u32 4294901760, %v1295_v8 }
 0x27f   :  { %1168 = vmatpush.msra.mxu1 %v1067_v20 }
 0x280   :  { %955 = vmatmul.f32.vlgmr.msra.gmra.mxu2 %v880_v15  ;;  %v881_v16 = vand.u32 4294901760, %v880_v15 }
 0x281   :  { %1170 = vmatpush.msra.mxu1 %v1069_v23  ;;  %1197 = vmatpush.msra.mxu2 %v1098_v25 }
 0x282   :  { %982 = vmatmul.f32.vlgmr.msra.gmra.mxu3 %v881_v16  ;;  %v882_v17 = vsub.f32 %v880_v15, %v881_v16  ;;  %v1306_v15 = vand.u32 4294901760, %v1305_v11  ;;  %v1311_v16 = vsub.f32 %v1242_v7, %v1269_v12 }
 0x283   :  { %1172 = vmatpush.msra.mxu1 %v1071_v27  ;;  %1201 = vmatpush.msra.mxu2 %v1104_v30 }
 0x284   :  { %v883_v18 = vand.u32 4294901760, %v882_v17  ;;  %1228 = vmatpush.msra.mxu3 %v1067_v20  ;;  %v1312_v19 = vand.u32 4294901760, %v1311_v16 }
 0x285   :  { %1174 = vmatpush.msra.mxu1 %v1073_v32  ;;  %1205 = vmatpush.msra.mxu2 %v1110_v35 }
 0x286   :  { %884 = vmatmul.f32.vlgmr.msra.gmra.mxu0 %v883_v18  ;;  %1040 = vmatmul.f32.vlgmr.msrb.gmra.mxu1 %v879_v14  ;;  %v1307_v18 = vsub.f32 %v1305_v11, %v1306_v15  ;;  %v1313_v21 = vsub.f32 %v1311_v16, %v1312_v19 }
 0x287   :  { %1139 = vmatpush.msra.mxu0 %v1097_v22  ;;  %1209 = vmatpush.msra.mxu2 %v1116_v39 }
 0x288   :  { %1230 = vmatpush.msra.mxu3 %v1069_v23  ;;  %1297 = vmatpush.msrb.mxu1 %v1296_v13  ;;  %v1308_v20 = vand.u32 4294901760, %v1307_v18  ;;  %v1314_v22 = vand.u32 4294901760, %v1313_v21  ;;  %v2065_v23 = vld [vmem:[#allocation7 + $0x5] ss:$0 sm:$0xff] }
 0x289   :  { %1142 = vmatpush.msra.mxu0 %v1103_v26 }
 0x28a   :  { %1232 = vmatpush.msra.mxu3 %v1071_v27 }
 0x28b   :  { %1145 = vmatpush.msra.mxu0 %v1109_v31 }
 0x28c   :  { %1234 = vmatpush.msra.mxu3 %v1073_v32 }
 0x28d   :  { %1148 = vmatpush.msra.mxu0 %v1115_v36 }
 0x28e   :  { %1015 = vmatmul.f32.vlgmr.msrb.gmra.mxu0 %v879_v14 }
 0x28f   :  { %1264 = vmatpush.msrb.mxu0 %v1263_v0 }
 0x2fb   :  { %v926_v44 = vpop.f32.mrf.mxu1 }
 0x303   :  { %v885_v45 = vpop.f32.mrf.mxu0  ;;  %v956_v48 = vpop.f32.mrf.mxu2 }
 0x304   :  { %v886_v46 = vadd.f32 %v2064_v43, %v885_v45  ;;  %v1041_v54 = vpop.f32.mrf.mxu1  ;;  %v1441_v43 = vld [vmem:[#allocation5 + $0xf8] sm:$0xff]  ;;  %v1440_v45 = vld [vmem:[#allocation5 + $0xf0] sm:$0xff] }
 0x305   :  { %v983_v50 = vpop.f32.mrf.mxu3 }
 0x306   :  { %v927_v47 = vadd.f32 %v926_v44, %v886_v46  ;;  %v1459_v44 = vand.u32 4294901760, %v1441_v43 }
 0x308   :  { %v957_v49 = vadd.f32 %v956_v48, %v927_v47  ;;  %v1489_v46 = vsub.f32 %v1441_v43, %v1459_v44  ;;  %v1461_v47 = vand.u32 4294901760, %v1440_v45  ;;  %v1439_v48 = vld [vmem:[#allocation5 + $0xe8] sm:$0xff] }
 0x30a   :  { %v984_v51 = vadd.f32 %v983_v50, %v957_v49  ;;  %v1490_v49 = vand.u32 4294901760, %v1489_v46  ;;  %v1495_v50 = vsub.f32 %v1440_v45, %v1461_v47 }
 0x30b   :  { %v1016_v52 = vpop.f32.mrf.mxu0 }
 0x30c   :  { %v1017_v53 = vadd.f32 %v1016_v52, %v984_v51  ;;  %v1463_v51 = vand.u32 4294901760, %v1439_v48  ;;  %v1438_v52 = vld [vmem:[#allocation5 + $0xe0] sm:$0xff] }
 0x30e   :  { %v1042_v55 = vadd.f32 %v1041_v54, %v1017_v53  ;;  %v1491_v53 = vsub.f32 %v1489_v46, %v1490_v49  ;;  %v1496_v54 = vand.u32 4294901760, %v1495_v50 }
 0x310   :  { %v2223_v56 = vadd.f32 %v1042_v55, %v2214_v9  ;;  %v1265_v9 = vand.u32 4294901760, %v1244_v1  ;;  %v1501_v55 = vsub.f32 %v1439_v48, %v1463_v51  ;;  %v2067_v48 = vld [vmem:[#allocation7 + $0x7] ss:$0 sm:$0xff] }
 0x312   :  { %v1053_v57 = vsel %vm71_vm1, %v2223_v56, 0  ;;  %v1299_v5 = vsub.f32 %v1244_v1, %v1265_v9  ;;  %1266 = vmatpush.msrb.mxu0 %v1265_v9 }
 0x313   :  { %v1075_v58 = vand.u32 4294901760, %v1053_v57 }
 0x314   :  { %v1300_v10 = vand.u32 4294901760, %v1299_v5  ;;  %1268 = vmatpush.msrb.mxu0 %v1267_v6 }
 0x315   :  { %1121 = vmatmul.f32.vlgmr.msrb.gmra.mxu3 %v1075_v58  ;;  %v1076_v59 = vsub.f32 %v1053_v57, %v1075_v58  ;;  %v1465_v57 = vand.u32 4294901760, %v1438_v52 }
 0x316   :  { %1364 = vmatpush.msrb.mxu3 %v1263_v0  ;;  %v1301_v14 = vsub.f32 %v1299_v5, %v1300_v10  ;;  %1270 = vmatpush.msrb.mxu0 %v1269_v12 }
 0x317   :  { %1151 = vmatmul.f32.vlgmr.msra.gmra.mxu0 %v1076_v59  ;;  %v1077_v60 = vand.u32 4294901760, %v1076_v59 }
 0x318   :  { %1366 = vmatpush.msrb.mxu3 %v1265_v9  ;;  %v1302_v17 = vand.u32 4294901760, %v1301_v14  ;;  %1393 = vmatpush.msra.mxu0 %v1294_v4 }
 0x319   :  { %1178 = vmatmul.f32.vlgmr.msra.gmra.mxu1 %v1077_v60  ;;  %v1078_v61 = vsub.f32 %v1076_v59, %v1077_v60  ;;  %v1497_v59 = vsub.f32 %v1495_v50, %v1496_v54  ;;  %v1502_v60 = vand.u32 4294901760, %v1501_v55 }
 0x31a   :  { %1368 = vmatpush.msrb.mxu3 %v1267_v6  ;;  %1303 = vmatpush.msrb.mxu1 %v1302_v17 }
 0x31b   :  { %v1079_v62 = vand.u32 4294901760, %v1078_v61  ;;  %1397 = vmatpush.msra.mxu0 %v1300_v10  ;;  %v1507_v61 = vsub.f32 %v1438_v52, %v1465_v57  ;;  %v1503_v63 = vsub.f32 %v1501_v55, %v1502_v60 }
 0x31c   :  { %1370 = vmatpush.msrb.mxu3 %v1269_v12  ;;  %1309 = vmatpush.msrb.mxu1 %v1308_v20 }
 0x31d   :  { %1080 = vmatmul.f32.vlgmr.msrb.gmra.mxu2 %v1079_v62  ;;  %1236 = vmatmul.f32.vlgmr.msra.gmra.mxu3 %v1075_v58  ;;  %v1498_v62 = vand.u32 4294901760, %v1497_v59  ;;  %v1504_v1 = vand.u32 4294901760, %v1503_v63 }
 0x31e   :  { %1335 = vmatpush.msrb.mxu2 %v1293_v2  ;;  %1401 = vmatpush.msra.mxu0 %v1306_v15 }
 0x31f   :  { %1315 = vmatpush.msrb.mxu1 %v1314_v22 }
 0x320   :  { %1338 = vmatpush.msrb.mxu2 %v1299_v5  ;;  %1405 = vmatpush.msra.mxu0 %v1312_v19 }
 0x321   :  { %1424 = vmatpush.msra.mxu1 %v1263_v0  ;;  %v1508_v0 = vand.u32 4294901760, %v1507_v61 }
 0x322   :  { %1341 = vmatpush.msrb.mxu2 %v1305_v11 }
 0x323   :  { %1426 = vmatpush.msra.mxu1 %v1265_v9  ;;  %v1509_v2 = vsub.f32 %v1507_v61, %v1508_v0 }
 0x324   :  { %1344 = vmatpush.msrb.mxu2 %v1311_v16 }
 0x325   :  { %1211 = vmatmul.f32.vlgmr.msra.gmra.mxu2 %v1075_v58  ;;  %1428 = vmatpush.msra.mxu1 %v1267_v6  ;;  %v1492_v58 = vand.u32 4294901760, %v1491_v53  ;;  %v1510_v9 = vand.u32 4294901760, %v1509_v2 }
 0x326   :  { %1460 = vmatpush.msra.mxu2 %v1459_v44 }
 0x327   :  { %1430 = vmatpush.msra.mxu1 %v1269_v12  ;;  %1493 = vmatpush.msra.mxu3 %v1492_v58 }
 0x328   :  { %1462 = vmatpush.msra.mxu2 %v1461_v47 }
 0x329   :  { %1499 = vmatpush.msra.mxu3 %v1498_v62 }
 0x32a   :  { %1464 = vmatpush.msra.mxu2 %v1463_v51 }
 0x32b   :  { %1505 = vmatpush.msra.mxu3 %v1504_v1 }
 0x32c   :  { %1466 = vmatpush.msra.mxu2 %v1465_v57 }
 0x32d   :  { %1511 = vmatpush.msra.mxu3 %v1510_v9 }
 0x394   :  { %v1152_v28 = vpop.f32.mrf.mxu0 }
 0x396   :  { %v1179_v30 = vpop.f32.mrf.mxu1 }
 0x398   :  { %v1122_v24 = vpop.f32.mrf.mxu3 }
 0x3a0   :  { %v1081_v25 = vpop.f32.mrf.mxu2  ;;  %v1237_v34 = vpop.f32.mrf.mxu3 }
 0x3a1   :  { %v1082_v26 = vadd.f32 %v2065_v23, %v1081_v25 }
 0x3a3   :  { %v1123_v27 = vadd.f32 %v1122_v24, %v1082_v26  ;;  %v1637_v24 = vld [vmem:[#allocation5 + $0x118] sm:$0xff]  ;;  %v1636_v26 = vld [vmem:[#allocation5 + $0x110] sm:$0xff] }
 0x3a4   :  { %v1655_v25 = vand.u32 4294901760, %v1637_v24 }
 0x3a5   :  { %v1153_v29 = vadd.f32 %v1152_v28, %v1123_v27  ;;  %v1657_v28 = vand.u32 4294901760, %v1636_v26 }
 0x3a6   :  { %v1685_v27 = vsub.f32 %v1637_v24, %v1655_v25 }
 0x3a7   :  { %v1180_v31 = vadd.f32 %v1179_v30, %v1153_v29  ;;  %v1635_v29 = vld [vmem:[#allocation5 + $0x108] sm:$0xff] }
 0x3a8   :  { %v1212_v32 = vpop.f32.mrf.mxu2  ;;  %v1686_v30 = vand.u32 4294901760, %v1685_v27 }
 0x3a9   :  { %v1213_v33 = vadd.f32 %v1212_v32, %v1180_v31  ;;  %v1691_v31 = vsub.f32 %v1636_v26, %v1657_v28  ;;  %v1659_v32 = vand.u32 4294901760, %v1635_v29 }
 0x3ab   :  { %v1238_v35 = vadd.f32 %v1237_v34, %v1213_v33  ;;  %v1634_v33 = vld [vmem:[#allocation5 + $0x100] sm:$0xff]  ;;  %v1687_v34 = vsub.f32 %v1685_v27, %v1686_v30 }
 0x3ad   :  { %v1240_v36 = vmax.f32 %v1238_v35, 0.0  ;;  %v1692_v35 = vand.u32 4294901760, %v1691_v31 }
 0x3af   :  { %v1249_v37 = vsel %vm71_vm1, %v1240_v36, 0  ;;  %v1697_v36 = vsub.f32 %v1635_v29, %v1659_v32  ;;  %v2068_v29 = vld [vmem:[#allocation7 + $0x8] ss:$0 sm:$0xff] }
 0x3b0   :  { %v1271_v38 = vand.u32 4294901760, %v1249_v37 }
 0x3b2   :  { %v1272_v39 = vsub.f32 %v1249_v37, %v1271_v38  ;;  %1317 = vmatmul.f32.vlgmr.msrb.gmra.mxu1 %v1271_v38  ;;  %v1661_v37 = vand.u32 4294901760, %v1634_v33 }
 0x3b3   :  { %1560 = vmatpush.msrb.mxu1 %v1459_v44 }
 0x3b4   :  { %1347 = vmatmul.f32.vlgmr.msrb.gmra.mxu2 %v1272_v39  ;;  %v1273_v40 = vand.u32 4294901760, %v1272_v39 }
 0x3b5   :  { %1562 = vmatpush.msrb.mxu1 %v1461_v47  ;;  %1589 = vmatpush.msrb.mxu2 %v1490_v49 }
 0x3b6   :  { %1374 = vmatmul.f32.vlgmr.msrb.gmra.mxu3 %v1273_v40  ;;  %v1274_v41 = vsub.f32 %v1272_v39, %v1273_v40  ;;  %v1693_v39 = vsub.f32 %v1691_v31, %v1692_v35  ;;  %v1698_v40 = vand.u32 4294901760, %v1697_v36 }
 0x3b7   :  { %1564 = vmatpush.msrb.mxu1 %v1463_v51  ;;  %1593 = vmatpush.msrb.mxu2 %v1496_v54 }
 0x3b8   :  { %v1275_v42 = vand.u32 4294901760, %v1274_v41  ;;  %1620 = vmatpush.msrb.mxu3 %v1459_v44  ;;  %v1703_v41 = vsub.f32 %v1634_v33, %v1661_v37  ;;  %v1699_v43 = vsub.f32 %v1697_v36, %v1698_v40 }
 0x3b9   :  { %1566 = vmatpush.msrb.mxu1 %v1465_v57  ;;  %1597 = vmatpush.msrb.mxu2 %v1502_v60 }
 0x3ba   :  { %1276 = vmatmul.f32.vlgmr.msrb.gmra.mxu0 %v1275_v42  ;;  %1432 = vmatmul.f32.vlgmr.msra.gmra.mxu1 %v1271_v38  ;;  %v1694_v42 = vand.u32 4294901760, %v1693_v39  ;;  %v1704_v44 = vand.u32 4294901760, %v1703_v41  ;;  %v1700_v45 = vand.u32 4294901760, %v1699_v43 }
 0x3bb   :  { %1531 = vmatpush.msrb.mxu0 %v1489_v46  ;;  %1601 = vmatpush.msrb.mxu2 %v1508_v0 }
 0x3bc   :  { %1622 = vmatpush.msrb.mxu3 %v1461_v47  ;;  %v1705_v46 = vsub.f32 %v1703_v41, %v1704_v44 }
 0x3bd   :  { %1534 = vmatpush.msrb.mxu0 %v1495_v50 }
 0x3be   :  { %1624 = vmatpush.msrb.mxu3 %v1463_v51  ;;  %v1706_v47 = vand.u32 4294901760, %v1705_v46 }
 0x3bf   :  { %1537 = vmatpush.msrb.mxu0 %v1501_v55 }
 0x3c0   :  { %1626 = vmatpush.msrb.mxu3 %v1465_v57 }
 0x3c1   :  { %1540 = vmatpush.msrb.mxu0 %v1507_v61 }
 0x3c2   :  { %1407 = vmatmul.f32.vlgmr.msra.gmra.mxu0 %v1271_v38  ;;  %v1688_v38 = vand.u32 4294901760, %v1687_v34 }
 0x3c3   :  { %1656 = vmatpush.msra.mxu0 %v1655_v25 }
 0x3c4   :  { %1689 = vmatpush.msra.mxu1 %v1688_v38 }
 0x3c5   :  { %1658 = vmatpush.msra.mxu0 %v1657_v28 }
 0x3c6   :  { %1695 = vmatpush.msra.mxu1 %v1694_v42 }
 0x3c7   :  { %1660 = vmatpush.msra.mxu0 %v1659_v32 }
 0x3c8   :  { %1701 = vmatpush.msra.mxu1 %v1700_v45 }
 0x3c9   :  { %1662 = vmatpush.msra.mxu0 %v1661_v37 }
 0x3ca   :  { %1707 = vmatpush.msra.mxu1 %v1706_v47 }
 0x42f   :  { %v1318_v4 = vpop.f32.mrf.mxu1 }
 0x437   :  { %v1277_v5 = vpop.f32.mrf.mxu0  ;;  %v1348_v8 = vpop.f32.mrf.mxu2 }
 0x438   :  { %v1278_v6 = vadd.f32 %v2066_v3, %v1277_v5  ;;  %v1433_v15 = vpop.f32.mrf.mxu1 }
 0x439   :  { %v1375_v11 = vpop.f32.mrf.mxu3 }
 0x43a   :  { %v1319_v7 = vadd.f32 %v1318_v4, %v1278_v6  ;;  %v1833_v4 = vld [vmem:[#allocation5 + $0x138] sm:$0xff]  ;;  %v1832_v6 = vld [vmem:[#allocation5 + $0x130] sm:$0xff] }
 0x43b   :  { %v1851_v5 = vand.u32 4294901760, %v1833_v4 }
 0x43c   :  { %v1349_v10 = vadd.f32 %v1348_v8, %v1319_v7  ;;  %v1853_v8 = vand.u32 4294901760, %v1832_v6 }
 0x43d   :  { %v1881_v7 = vsub.f32 %v1833_v4, %v1851_v5 }
 0x43e   :  { %v1376_v12 = vadd.f32 %v1375_v11, %v1349_v10  ;;  %v1831_v10 = vld [vmem:[#allocation5 + $0x128] sm:$0xff] }
 0x43f   :  { %v1408_v13 = vpop.f32.mrf.mxu0  ;;  %v1882_v11 = vand.u32 4294901760, %v1881_v7 }
 0x440   :  { %v1409_v14 = vadd.f32 %v1408_v13, %v1376_v12  ;;  %v1887_v12 = vsub.f32 %v1832_v6, %v1853_v8  ;;  %v1855_v13 = vand.u32 4294901760, %v1831_v10 }
 0x442   :  { %v1434_v16 = vadd.f32 %v1433_v15, %v1409_v14  ;;  %v1830_v14 = vld [vmem:[#allocation5 + $0x120] sm:$0xff]  ;;  %v1883_v15 = vsub.f32 %v1881_v7, %v1882_v11 }
 0x444   :  { %v1436_v17 = vmax.f32 %v1434_v16, 0.0  ;;  %v1888_v16 = vand.u32 4294901760, %v1887_v12 }
 0x446   :  { %v1445_v18 = vsel %vm71_vm1, %v1436_v17, 0  ;;  %v1893_v17 = vsub.f32 %v1831_v10, %v1855_v13 }
 0x447   :  { %v1467_v19 = vand.u32 4294901760, %v1445_v18 }
 0x449   :  { %v1468_v20 = vsub.f32 %v1445_v18, %v1467_v19  ;;  %1513 = vmatmul.f32.vlgmr.msra.gmra.mxu3 %v1467_v19  ;;  %v1857_v18 = vand.u32 4294901760, %v1830_v14 }
 0x44a   :  { %1756 = vmatpush.msra.mxu3 %v1655_v25 }
 0x44b   :  { %1543 = vmatmul.f32.vlgmr.msrb.gmra.mxu0 %v1468_v20  ;;  %v1469_v21 = vand.u32 4294901760, %v1468_v20 }
 0x44c   :  { %1758 = vmatpush.msra.mxu3 %v1657_v28  ;;  %1785 = vmatpush.msrb.mxu0 %v1686_v30 }
 0x44d   :  { %1570 = vmatmul.f32.vlgmr.msrb.gmra.mxu1 %v1469_v21  ;;  %v1470_v22 = vsub.f32 %v1468_v20, %v1469_v21  ;;  %v1889_v20 = vsub.f32 %v1887_v12, %v1888_v16  ;;  %v1894_v21 = vand.u32 4294901760, %v1893_v17 }
 0x44e   :  { %1760 = vmatpush.msra.mxu3 %v1659_v32  ;;  %1789 = vmatpush.msrb.mxu0 %v1692_v35 }
 0x44f   :  { %v1471_v23 = vand.u32 4294901760, %v1470_v22  ;;  %1816 = vmatpush.msrb.mxu1 %v1655_v25  ;;  %v1899_v22 = vsub.f32 %v1830_v14, %v1857_v18  ;;  %v1895_v24 = vsub.f32 %v1893_v17, %v1894_v21 }
 0x450   :  { %1762 = vmatpush.msra.mxu3 %v1661_v37  ;;  %1793 = vmatpush.msrb.mxu0 %v1698_v40 }
 0x451   :  { %1472 = vmatmul.f32.vlgmr.msra.gmra.mxu2 %v1471_v23  ;;  %1628 = vmatmul.f32.vlgmr.msrb.gmra.mxu3 %v1467_v19  ;;  %v1890_v23 = vand.u32 4294901760, %v1889_v20  ;;  %v1900_v25 = vand.u32 4294901760, %v1899_v22  ;;  %v1896_v26 = vand.u32 4294901760, %v1895_v24 }
 0x452   :  { %1727 = vmatpush.msra.mxu2 %v1685_v27  ;;  %1797 = vmatpush.msrb.mxu0 %v1704_v44 }
 0x453   :  { %1818 = vmatpush.msrb.mxu1 %v1657_v28  ;;  %v1901_v27 = vsub.f32 %v1899_v22, %v1900_v25 }
 0x454   :  { %1730 = vmatpush.msra.mxu2 %v1691_v31 }
 0x455   :  { %1820 = vmatpush.msrb.mxu1 %v1659_v32  ;;  %v1902_v28 = vand.u32 4294901760, %v1901_v27 }
 0x456   :  { %1733 = vmatpush.msra.mxu2 %v1697_v36 }
 0x457   :  { %1822 = vmatpush.msrb.mxu1 %v1661_v37 }
 0x458   :  { %1736 = vmatpush.msra.mxu2 %v1703_v41 }
 0x459   :  { %1603 = vmatmul.f32.vlgmr.msrb.gmra.mxu2 %v1467_v19  ;;  %v1884_v19 = vand.u32 4294901760, %v1883_v15 }
 0x45a   :  { %1852 = vmatpush.msrb.mxu2 %v1851_v5 }
 0x45b   :  { %1885 = vmatpush.msrb.mxu3 %v1884_v19 }
 0x45c   :  { %1854 = vmatpush.msrb.mxu2 %v1853_v8 }
 0x45d   :  { %1891 = vmatpush.msrb.mxu3 %v1890_v23 }
 0x45e   :  { %1856 = vmatpush.msrb.mxu2 %v1855_v13 }
 0x45f   :  { %1897 = vmatpush.msrb.mxu3 %v1896_v26 }
 0x460   :  { %1858 = vmatpush.msrb.mxu2 %v1857_v18 }
 0x461   :  { %1903 = vmatpush.msrb.mxu3 %v1902_v28 }
 0x4c8   :  { %v1544_v53 = vpop.f32.mrf.mxu0 }
 0x4ca   :  { %v1571_v55 = vpop.f32.mrf.mxu1 }
 0x4cc   :  { %v1514_v49 = vpop.f32.mrf.mxu3 }
 0x4d4   :  { %v1473_v50 = vpop.f32.mrf.mxu2  ;;  %v1629_v60 = vpop.f32.mrf.mxu3 }
 0x4d5   :  { %v1474_v51 = vadd.f32 %v2067_v48, %v1473_v50 }
 0x4d7   :  { %v1515_v52 = vadd.f32 %v1514_v49, %v1474_v51  ;;  %v2069_v49 = vld [vmem:[#allocation7 + $0x9] ss:$0 sm:$0xff] }
 0x4d9   :  { %v1545_v54 = vadd.f32 %v1544_v53, %v1515_v52 }
 0x4db   :  { %v1572_v57 = vadd.f32 %v1571_v55, %v1545_v54 }
 0x4dc   :  { %v1604_v58 = vpop.f32.mrf.mxu2 }
 0x4dd   :  { %v1605_v59 = vadd.f32 %v1604_v58, %v1572_v57 }
 0x4df   :  { %v1630_v61 = vadd.f32 %v1629_v60, %v1605_v59 }
 0x4e1   :  { %v1632_v62 = vmax.f32 %v1630_v61, 0.0 }
 0x4e3   :  { %v1641_v63 = vsel %vm71_vm1, %v1632_v62, 0 }
 0x4e4   :  { %v1663_v0 = vand.u32 4294901760, %v1641_v63 }
 0x4e6   :  { %v1664_v1 = vsub.f32 %v1641_v63, %v1663_v0  ;;  %1709 = vmatmul.f32.vlgmr.msra.gmra.mxu1 %v1663_v0 }
 0x4e7   :  { %1952 = vmatpush.msra.mxu1 %v1851_v5 }
 0x4e8   :  { %1739 = vmatmul.f32.vlgmr.msra.gmra.mxu2 %v1664_v1  ;;  %v1665_v2 = vand.u32 4294901760, %v1664_v1 }
 0x4e9   :  { %1954 = vmatpush.msra.mxu1 %v1853_v8  ;;  %1981 = vmatpush.msra.mxu2 %v1882_v11 }
 0x4ea   :  { %1766 = vmatmul.f32.vlgmr.msra.gmra.mxu3 %v1665_v2  ;;  %v1666_v9 = vsub.f32 %v1664_v1, %v1665_v2 }
 0x4eb   :  { %1956 = vmatpush.msra.mxu1 %v1855_v13  ;;  %1985 = vmatpush.msra.mxu2 %v1888_v16 }
 0x4ec   :  { %v1667_v3 = vand.u32 4294901760, %v1666_v9  ;;  %2012 = vmatpush.msra.mxu3 %v1851_v5 }
 0x4ed   :  { %1958 = vmatpush.msra.mxu1 %v1857_v18  ;;  %1989 = vmatpush.msra.mxu2 %v1894_v21 }
 0x4ee   :  { %1668 = vmatmul.f32.vlgmr.msra.gmra.mxu0 %v1667_v3  ;;  %1824 = vmatmul.f32.vlgmr.msrb.gmra.mxu1 %v1663_v0 }
 0x4ef   :  { %1923 = vmatpush.msra.mxu0 %v1881_v7  ;;  %1993 = vmatpush.msra.mxu2 %v1900_v25 }
 0x4f0   :  { %2014 = vmatpush.msra.mxu3 %v1853_v8 }
 0x4f1   :  { %1926 = vmatpush.msra.mxu0 %v1887_v12 }
 0x4f2   :  { %2016 = vmatpush.msra.mxu3 %v1855_v13 }
 0x4f3   :  { %1929 = vmatpush.msra.mxu0 %v1893_v17 }
 0x4f4   :  { %2018 = vmatpush.msra.mxu3 %v1857_v18 }
 0x4f5   :  { %1932 = vmatpush.msra.mxu0 %v1899_v22 }
 0x4f6   :  { %1799 = vmatmul.f32.vlgmr.msrb.gmra.mxu0 %v1663_v0 }
 0x563   :  { %v1710_v30 = vpop.f32.mrf.mxu1 }
 0x56b   :  { %v1669_v31 = vpop.f32.mrf.mxu0  ;;  %v1740_v34 = vpop.f32.mrf.mxu2 }
 0x56c   :  { %v1670_v32 = vadd.f32 %v2068_v29, %v1669_v31  ;;  %v1825_v40 = vpop.f32.mrf.mxu1 }
 0x56d   :  { %v1767_v36 = vpop.f32.mrf.mxu3 }
 0x56e   :  { %v1711_v33 = vadd.f32 %v1710_v30, %v1670_v32 }
 0x570   :  { %v1741_v35 = vadd.f32 %v1740_v34, %v1711_v33 }
 0x572   :  { %v1768_v37 = vadd.f32 %v1767_v36, %v1741_v35 }
 0x573   :  { %v1800_v38 = vpop.f32.mrf.mxu0 }
 0x574   :  { %v1801_v39 = vadd.f32 %v1800_v38, %v1768_v37 }
 0x576   :  { %v1826_v41 = vadd.f32 %v1825_v40, %v1801_v39 }
 0x578   :  { %v1828_v42 = vmax.f32 %v1826_v41, 0.0 }
 0x57a   :  { %v1837_v43 = vsel %vm71_vm1, %v1828_v42, 0 }
 0x57b   :  { %v1859_v44 = vand.u32 4294901760, %v1837_v43 }
 0x57d   :  { %v1860_v45 = vsub.f32 %v1837_v43, %v1859_v44  ;;  %1905 = vmatmul.f32.vlgmr.msrb.gmra.mxu3 %v1859_v44 }
 0x57f   :  { %1935 = vmatmul.f32.vlgmr.msra.gmra.mxu0 %v1860_v45  ;;  %v1861_v46 = vand.u32 4294901760, %v1860_v45 }
 0x581   :  { %1962 = vmatmul.f32.vlgmr.msra.gmra.mxu1 %v1861_v46  ;;  %v1862_v47 = vsub.f32 %v1860_v45, %v1861_v46 }
 0x583   :  { %v1863_v48 = vand.u32 4294901760, %v1862_v47 }
 0x585   :  { %1864 = vmatmul.f32.vlgmr.msrb.gmra.mxu2 %v1863_v48  ;;  %2020 = vmatmul.f32.vlgmr.msra.gmra.mxu3 %v1859_v44 }
 0x58d   :  { %1995 = vmatmul.f32.vlgmr.msra.gmra.mxu2 %v1859_v44 }
 0x5fc   :  { %v1936_v54 = vpop.f32.mrf.mxu0 }
 0x5fe   :  { %v1963_v57 = vpop.f32.mrf.mxu1 }
 0x600   :  { %v1906_v50 = vpop.f32.mrf.mxu3 }
 0x608   :  { %v1865_v51 = vpop.f32.mrf.mxu2  ;;  %v2021_v61 = vpop.f32.mrf.mxu3 }
 0x609   :  { %v1866_v52 = vadd.f32 %v2069_v49, %v1865_v51 }
 0x60b   :  { %v1907_v53 = vadd.f32 %v1906_v50, %v1866_v52 }
 0x60d   :  { %v1937_v55 = vadd.f32 %v1936_v54, %v1907_v53 }
 0x60f   :  { %v1964_v58 = vadd.f32 %v1963_v57, %v1937_v55 }
 0x610   :  { %v1996_v59 = vpop.f32.mrf.mxu2 }
 0x611   :  { %v1997_v60 = vadd.f32 %v1996_v59, %v1964_v58 }
 0x613   :  { %v2022_v62 = vadd.f32 %v2021_v61, %v1997_v60 }
 0x615   :  { %v2024_v63 = vadd.f32 %v2022_v62, %v2223_v56 }
 0x617   :  { %2027 = vrot.lane.b32.xlu0 %v2024_v63, %s2178_s8  ;;  %2025 = vst.msk [vmem:[#allocation8] sm:$0xff] %vm63_vm0, %v2024_v63 }
 0x618   :  { %2041 = dma.vmem_to_hbm [thread:$0]  %s2037_s2, 128, %s2039_s7, [#allocation4]  }
 0x689   :  { %v2028_v0 = vpop.permute.xlu0 %2027 }
 0x68a   :  { %2030 = vst.msk [vmem:[%s2244_s4] sm:$0xff] %vm63_vm0, %v2028_v0 }
 0x68b   :  { %2170 = dma.done.wait [#allocation4], 128  }
 0x68c   :  { %2171 = vsyncadd [#allocation4], 4294967168 }
 0x68d   :  { %2050 = vsyncpa [#allocation3], 1 }
 0x68e   :  { %2051 = vsyncpa [#allocation6], 1 }
 0x68f   :  { %2052 = vsyncpa [#allocation4], 1 }

</bundles_post_ra>
